<compile_context>
chip_gen: v7x
topology: tpu7x:2x2x1
jax: 0.10.0
libtpu: 0.0.40
codegen_flags: <defaults>
</compile_context>

<pallas_src>
import functools

import jax
import jax.numpy as jnp
from jax.experimental import pallas as pl
from jax.experimental.pallas import tpu as pltpu


def _round_up(n, m):
    return ((n + m - 1) // m) * m


def sae_kernel(x_ref, w1t_ref, b1_ref, w2t_ref, b2_ref, r_ref, h_ref, *, n_hidden):
    # x arrives straight from HBM as f32; cast to bf16 in-vreg for the MXU.
    x = x_ref[...].astype(jnp.bfloat16)                                # (TB, M)

    # Encoder: h = relu(x @ W1.T + b1); hidden dim zero-padded to Hp lanes.
    h = jnp.dot(x, w1t_ref[...], preferred_element_type=jnp.float32)   # (TB, Hp)
    h = jnp.maximum(h + b1_ref[...], 0.0)                              # f32

    # Decoder: r = h @ W2.T + b2 (padded rows of w2t are zero -> exact).
    r = jnp.dot(h.astype(jnp.bfloat16), w2t_ref[...],
                preferred_element_type=jnp.float32) + b2_ref[...]      # (TB, M)
    r_ref[...] = r.astype(r_ref.dtype)

    # Compact hidden writeback: full aligned transpose (XLU slot is otherwise
    # idle), then keep only the true n_hidden rows. The store is lane-dense
    # along the batch tile; only n_hidden of the padded 128 columns ever hit HBM.
    h_ref[...] = jnp.transpose(h)[:n_hidden, :].astype(h_ref.dtype)    # (H, TB)


def prepare_params(w1, b1, w2, b2):
    """One-time parameter prep (hoisted out of the forward path):
    transpose to (K, N) layout, zero-pad the hidden dim to a multiple of 128
    lanes, and cast matmul operands to bf16 (accumulation stays f32 in-kernel).
    PyTorch layout in: w1 (H, M), b1 (H,), w2 (M, H), b2 (M,)."""
    H, M = w1.shape
    Hp = _round_up(H, 128)

    w1t = jnp.zeros((M, Hp), jnp.bfloat16)
    w1t = w1t.at[:, :H].set(w1.T.astype(jnp.bfloat16))                 # (M, Hp)
    b1p = jnp.zeros((1, Hp), jnp.float32)
    b1p = b1p.at[:, :H].set(b1.astype(jnp.float32))                    # (1, Hp)

    w2t = jnp.zeros((Hp, M), jnp.bfloat16)
    w2t = w2t.at[:H, :].set(w2.T.astype(jnp.bfloat16))                 # (Hp, M)
    b2p = b2.reshape(1, M).astype(jnp.float32)                         # (1, M)

    return {"w1t": w1t, "b1": b1p, "w2t": w2t, "b2": b2p, "n_hidden": H}


def sae_forward(x, params, *, tb=512, r_dtype=jnp.float32):
    """x: (B, n_input) float32. Returns (r, h) matching SAE.forward."""
    w1t, b1, w2t, b2 = params["w1t"], params["b1"], params["w2t"], params["b2"]
    H = params["n_hidden"]
    B, M = x.shape
    Hp = w1t.shape[1]

    # Batch tile: large (amortizes per-step grid overhead) but capped so the grid
    # keeps >= 2 steps whenever the batch permits (pipelining + both v7x TCs).
    tb = min(tb, _round_up(B, 8))
    if B > 8:
        tb = min(tb, max(8, _round_up(-(-B // 2), 8)))
    Bp = _round_up(B, tb)
    if Bp != B:
        # Rare ragged-batch case only; padded rows are sliced away below.
        x = jnp.pad(x, ((0, Bp - B), (0, 0)))
    grid = (Bp // tb,)

    r_bytes = jnp.dtype(r_dtype).itemsize
    flops = 4 * Bp * M * Hp                        # two (Bp,M)x(M,Hp)-sized matmuls
    bytes_accessed = (Bp * M * 4                   # x (f32 in)
                      + (w1t.size + w2t.size) * 2  # resident bf16 weights
                      + (b1.size + b2.size) * 4    # biases (f32)
                      + Bp * M * r_bytes           # r out
                      + H * Bp * 4)                # compact h out

    # Tight VMEM bound from the actual double-buffered block footprint
    # (x2 safety factor + 2 MiB for compiler-internal scratch).
    block_bytes = (2 * tb * M * 4                  # x blocks (f32)
                   + 2 * tb * M * r_bytes          # r blocks
                   + 2 * H * tb * 4                # compact h blocks
                   + 2 * (w1t.size + w2t.size) * 2 # resident weights (bf16)
                   + 2 * (b1.size + b2.size) * 4)  # biases
    vmem_limit = min(100 * 1024 * 1024,
                     _round_up(2 * int(block_bytes), 1024 * 1024) + 2 * 1024 * 1024)

    # NOTE: if tb is pushed toward 1024+ and the bundle dump shows vreg spills,
    # chunk the r compute/store inside the kernel (fori_loop, unroll=True).
    kernel = functools.partial(sae_kernel, n_hidden=H)

    r_pad, h_t = pl.pallas_call(
        kernel,
        out_shape=(jax.ShapeDtypeStruct((Bp, M), r_dtype),
                   jax.ShapeDtypeStruct((H, Bp), jnp.float32)),
        grid_spec=pltpu.PrefetchScalarGridSpec(
            num_scalar_prefetch=0,
            grid=grid,
            in_specs=[
                pl.BlockSpec((tb, M), lambda i: (i, 0)),   # x: streamed f32 tiles
                pl.BlockSpec((M, Hp), lambda i: (0, 0)),   # w1t: resident
                pl.BlockSpec((1, Hp), lambda i: (0, 0)),   # b1:  resident
                pl.BlockSpec((Hp, M), lambda i: (0, 0)),   # w2t: resident
                pl.BlockSpec((1, M), lambda i: (0, 0)),    # b2:  resident
            ],
            out_specs=[
                pl.BlockSpec((tb, M), lambda i: (i, 0)),   # r
                pl.BlockSpec((H, tb), lambda i: (0, i)),   # h: compact, transposed
            ],
        ),
        compiler_params=pltpu.CompilerParams(
            dimension_semantics=("parallel",),             # shard batch across TCs
            vmem_limit_bytes=int(vmem_limit),
        ),
        cost_estimate=pl.CostEstimate(flops=int(flops), transcendentals=0,
                                      bytes_accessed=int(bytes_accessed)),
    )(x, w1t, b1, w2t, b2)

    r = r_pad if Bp == B else r_pad[:B]
    h = (h_t if Bp == B else h_t[:, :B]).T                 # (B, H), tiny transpose
    return r, h


def _linear_init(key, out_features, in_features):
    """Deterministic PyTorch-style uniform init: U(-1/sqrt(fan_in), 1/sqrt(fan_in))."""
    kw, kb = jax.random.split(key)
    bound = 1.0 / jnp.sqrt(jnp.float32(in_features))
    w = jax.random.uniform(kw, (out_features, in_features), jnp.float32, -bound, bound)
    b = jax.random.uniform(kb, (out_features,), jnp.float32, -bound, bound)
    return w, b


if __name__ == "__main__":
    n_input = 256          # e.g. number of movies (lane-aligned, still small)
    n_hidden = 2           # matches the PyTorch global
    batch = 256            # two 128-row batch tiles -> grid=(2,)

    root = jax.random.PRNGKey(0)
    k_x, k_fc1, k_fc2 = jax.random.split(root, 3)

    x = jax.random.normal(k_x, (batch, n_input), jnp.float32)
    w1, b1 = _linear_init(k_fc1, n_hidden, n_input)    # SAE.fc1
    w2, b2 = _linear_init(k_fc2, n_input, n_hidden)    # SAE.fc2

    params = prepare_params(w1, b1, w2, b2)            # one-time prep
    r, h = sae_forward(x, params)
    jax.block_until_ready((r, h))

    assert r.shape == (batch, n_input) and h.shape == (batch, n_hidden)

    # Reference that mirrors the kernel's bf16-input / f32-accumulate arithmetic.
    xb = x.astype(jnp.bfloat16).astype(jnp.float32)
    w1b = w1.astype(jnp.bfloat16).astype(jnp.float32)
    w2b = w2.astype(jnp.bfloat16).astype(jnp.float32)
    h_ref = jnp.maximum(xb @ w1b.T + b1, 0.0)
    r_ref = h_ref.astype(jnp.bfloat16).astype(jnp.float32) @ w2b.T + b2
    assert bool(jnp.allclose(h, h_ref, atol=1e-3, rtol=1e-3))
    assert bool(jnp.allclose(r, r_ref, atol=1e-3, rtol=1e-3))

    # Loose sanity check against the pure-fp32 PyTorch-equivalent math.
    h32 = jnp.maximum(x @ w1.T + b1, 0.0)
    r32 = h32 @ w2.T + b2
    assert bool(jnp.allclose(h, h32, atol=5e-2, rtol=5e-2))
    assert bool(jnp.allclose(r, r32, atol=5e-2, rtol=5e-2))

    print("KERNEL_OK")
</pallas_src>

<mosaic_0001>
module attributes {stable_mosaic.version = 11 : i64} {
  func.func @sae_kernel(%arg0: i32, %arg1: memref<128x256xf32, #tpu.memory_space<vmem>>, %arg2: memref<256x128xbf16, #tpu.memory_space<vmem>>, %arg3: memref<1x128xf32, #tpu.memory_space<vmem>>, %arg4: memref<128x256xbf16, #tpu.memory_space<vmem>>, %arg5: memref<1x256xf32, #tpu.memory_space<vmem>>, %arg6: memref<128x256xf32, #tpu.memory_space<vmem>>, %arg7: memref<2x128xf32, #tpu.memory_space<vmem>>) attributes {dimension_semantics = [#tpu.dimension_semantics<parallel>], iteration_bounds = array<i64: 2>, scalar_prefetch = 0 : i64, scratch_operands = 0 : i64, tpu.core_type = #tpu.core_type<tc>, window_params = [{transform_indices = @transform_0, window_bounds = array<i64: 128, 256>}, {pipeline_mode = #tpu.pipeline_mode<synchronous>, transform_indices = @transform_1, window_bounds = array<i64: 256, 128>}, {pipeline_mode = #tpu.pipeline_mode<synchronous>, transform_indices = @transform_2, window_bounds = array<i64: 1, 128>}, {pipeline_mode = #tpu.pipeline_mode<synchronous>, transform_indices = @transform_3, window_bounds = array<i64: 128, 256>}, {pipeline_mode = #tpu.pipeline_mode<synchronous>, transform_indices = @transform_4, window_bounds = array<i64: 1, 256>}, {transform_indices = @transform_5, window_bounds = array<i64: 128, 256>}, {transform_indices = @transform_6, window_bounds = array<i64: 2, 128>}]} {
    %c0 = arith.constant 0 : index
    %c0_0 = arith.constant 0 : index
    %0 = vector.load %arg1[%c0, %c0_0] : memref<128x256xf32, #tpu.memory_space<vmem>>, vector<128x256xf32>
    %1 = arith.truncf %0 : vector<128x256xf32> to vector<128x256xbf16>
    %c0_1 = arith.constant 0 : index
    %c0_2 = arith.constant 0 : index
    %2 = vector.load %arg2[%c0_1, %c0_2] : memref<256x128xbf16, #tpu.memory_space<vmem>>, vector<256x128xbf16>
    %cst = arith.constant dense<0.000000e+00> : vector<128x128xf32>
    %3 = tpu.matmul %1, %2, %cst {dimension_numbers = #tpu.dot_dimension_numbers<[1], [0], [0], [1], [0, 0, 1, 1], [], []>} : vector<128x256xbf16>, vector<256x128xbf16>, vector<128x128xf32> -> vector<128x128xf32>
    %c0_3 = arith.constant 0 : index
    %c0_4 = arith.constant 0 : index
    %4 = vector.load %arg3[%c0_3, %c0_4] : memref<1x128xf32, #tpu.memory_space<vmem>>, vector<1x128xf32>
    %5 = vector.broadcast %4 : vector<1x128xf32> to vector<128x128xf32>
    %6 = arith.addf %3, %5 : vector<128x128xf32>
    %cst_5 = arith.constant 0.000000e+00 : f32
    %7 = vector.broadcast %cst_5 : f32 to vector<128x128xf32>
    %8 = arith.maximumf %6, %7 : vector<128x128xf32>
    %9 = arith.truncf %8 : vector<128x128xf32> to vector<128x128xbf16>
    %c0_6 = arith.constant 0 : index
    %c0_7 = arith.constant 0 : index
    %10 = vector.load %arg4[%c0_6, %c0_7] : memref<128x256xbf16, #tpu.memory_space<vmem>>, vector<128x256xbf16>
    %cst_8 = arith.constant dense<0.000000e+00> : vector<128x256xf32>
    %11 = tpu.matmul %9, %10, %cst_8 {dimension_numbers = #tpu.dot_dimension_numbers<[1], [0], [0], [1], [0, 0, 1, 1], [], []>} : vector<128x128xbf16>, vector<128x256xbf16>, vector<128x256xf32> -> vector<128x256xf32>
    %c0_9 = arith.constant 0 : index
    %c0_10 = arith.constant 0 : index
    %12 = vector.load %arg5[%c0_9, %c0_10] : memref<1x256xf32, #tpu.memory_space<vmem>>, vector<1x256xf32>
    %13 = vector.broadcast %12 : vector<1x256xf32> to vector<128x256xf32>
    %14 = arith.addf %11, %13 : vector<128x256xf32>
    %c0_11 = arith.constant 0 : index
    %c0_12 = arith.constant 0 : index
    %15 = vector.load %arg6[%c0_11, %c0_12] : memref<128x256xf32, #tpu.memory_space<vmem>>, vector<128x256xf32>
    tpu.vector_store %arg6[%c0_11, %c0_12], %14 {strides = array<i32>} : memref<128x256xf32, #tpu.memory_space<vmem>>, vector<128x256xf32>,
    %16 = tpu.transpose %8, [1, 0] : vector<128x128xf32> -> vector<128x128xf32>
    %17 = vector.extract_strided_slice %16 {offsets = [0, 0], sizes = [2, 128], strides = [1, 1]} : vector<128x128xf32> to vector<2x128xf32>
    %c0_13 = arith.constant 0 : index
    %c0_14 = arith.constant 0 : index
    %18 = vector.load %arg7[%c0_13, %c0_14] : memref<2x128xf32, #tpu.memory_space<vmem>>, vector<2x128xf32>
    tpu.vector_store %arg7[%c0_13, %c0_14], %17 {strides = array<i32>} : memref<2x128xf32, #tpu.memory_space<vmem>>, vector<2x128xf32>,
    return
  }
  func.func @transform_0(%arg0: i32) -> (i32, i32) {
    %c0_i32 = arith.constant 0 : i32
    %c0_i32_0 = arith.constant 0 : i32
    return %arg0, %c0_i32 : i32, i32
  }
  func.func @transform_1(%arg0: i32) -> (i32, i32) {
    %c0_i32 = arith.constant 0 : i32
    %c0_i32_0 = arith.constant 0 : i32
    %c0_i32_1 = arith.constant 0 : i32
    return %c0_i32, %c0_i32_0 : i32, i32
  }
  func.func @transform_2(%arg0: i32) -> (i32, i32) {
    %c0_i32 = arith.constant 0 : i32
    %c0_i32_0 = arith.constant 0 : i32
    %c0_i32_1 = arith.constant 0 : i32
    return %c0_i32, %c0_i32_0 : i32, i32
  }
  func.func @transform_3(%arg0: i32) -> (i32, i32) {
    %c0_i32 = arith.constant 0 : i32
    %c0_i32_0 = arith.constant 0 : i32
    %c0_i32_1 = arith.constant 0 : i32
    return %c0_i32, %c0_i32_0 : i32, i32
  }
  func.func @transform_4(%arg0: i32) -> (i32, i32) {
    %c0_i32 = arith.constant 0 : i32
    %c0_i32_0 = arith.constant 0 : i32
    %c0_i32_1 = arith.constant 0 : i32
    return %c0_i32, %c0_i32_0 : i32, i32
  }
  func.func @transform_5(%arg0: i32) -> (i32, i32) {
    %c0_i32 = arith.constant 0 : i32
    %c0_i32_0 = arith.constant 0 : i32
    return %arg0, %c0_i32 : i32, i32
  }
  func.func @transform_6(%arg0: i32) -> (i32, i32) {
    %c0_i32 = arith.constant 0 : i32
    %c0_i32_0 = arith.constant 0 : i32
    return %c0_i32, %arg0 : i32, i32
  }
}

</mosaic_0001>

<bundles_post_ra>
// kernel: tpu_custom_call.1
= control target key start
LH: loop header
LB: loop body
LE: loop exit
PB: predicated region body
PF: predicated region fallthrough
CT: control target
= control target key end

     0   :  { %12 = vsyncpa [#allocation3], 0  ;;  %s1944_s0 = inlined_call_operand.hbm [shape: f32[256,256], index: 0, kind: input, shape index: {}]   ;;  %s1945_s1 = inlined_call_operand.hbm [shape: bf16[256,128], index: 1, kind: input, shape index: {}]   ;;  %s1946_s2 = inlined_call_operand.vmem [shape: f32[1,128], index: 2, kind: input, shape index: {}]   ;;  %s1947_s3 = inlined_call_operand.hbm [shape: bf16[128,256], index: 3, kind: input, shape index: {}]   ;;  %s1948_s4 = inlined_call_operand.vmem [shape: f32[1,256], index: 4, kind: input, shape index: {}]   ;;  %s1949_s5 = inlined_call_operand.hbm [shape: f32[256,256], index: 5, kind: output, shape index: {0}]   ;;  %s1950_s6 = inlined_call_operand.hbm [shape: f32[2,256], index: 6, kind: output, shape index: {1}]  }
   0x1   :  { %14 = vsyncpa [#allocation3 + $0x1], 0 }
   0x2   :  { %15 = vsyncpa [#allocation6], 0 }
   0x3   :  { %16 = vsyncpa [#allocation4], 0 }
   0x4   :  { %18 = vsyncpa [#allocation4 + $0x1], 0 }
   0x5   :  { %19 = vsyncpa [#allocation10], 0 }
   0x6   :  { %21 = vsyncpa [#allocation10 + $0x1], 0  ;;  %s1545_s21 = smov 0   ;;  %s1547_s22 = smov 0  }
   0x7   :  { %s1549_s23 = smov 0   ;;  %s1551_s24 = smov 0  }
   0x8 LB: > { %s1566_s25 = sadd.s32 4294967295, %s1494_s24   ;;  %s1061_s26 = sadd.s32 4294967294, %s1494_s24   ;;  %s1494_s24 = sphi %s1551_s24, %s1970_s24   ;;  %s1490_s23 = sphi %s1549_s23, %s1969_s23   ;;  %s1486_s22 = sphi %s1547_s22, %s1968_s22   ;;  %s1482_s21 = sphi %s1545_s21, %s1967_s21  }
   0x9   : > { %p47_p0 = scmp.ne.s32.totalorder %s1486_s22, %s1482_s21  ;;  %p1951_p1 = scmp.eq.s32.totalorder %s1566_s25, 0 }
   0xa   : > { %p161_p3 = scmp.eq.s32.totalorder %s1061_s26, 1  ;;  %p1062_p5 = scmp.ge.s32.totalorder %s1494_s24, 1 }
   0xb   : > { %p1575_p4 = por %p1951_p1, %p47_p0  ;;  %p194_p7 = scmp.lt.s32.totalorder %s1494_s24, 3 }
   0xc   : > { %p1580_p6 = por %p161_p3, %p47_p0  ;;  %s1496_s30 = smov [#allocation5]  }
   0xd   : > { %s1954_s27 = scalar_select %p1575_p4, 1, 0 }
   0xe   : > { %s1955_s28 = scalar_select %p1580_p6, 1, 0 }
   0xf   : > { %p1585_p8 = pnand %p1062_p5, %p194_p7  ;;  %s206_s7 = sshll.u32 %s1496_s30, 4  ;;  %s1589_s7 = int_to_ptr.vmem [resolvable:$true] %s206_s7 }
  0x10   : > { %s1497_s9 = smov [#allocation7]   ;;  %s1306_s13 = scalar_lea.hbm %s1945_s1, 2048 }
  0x11   : > { %p1199_p9 = pneg %p1585_p8  ;;  %s222_s10 = sshll.u32 %s1497_s9, 4  ;;  %s1600_s10 = int_to_ptr.vmem [resolvable:$true] %s222_s10 }
  0x12   : > { %p1307_p12 = scmp.ne.s32.totalorder %s1945_s1, %s1306_s13  ;;  %p1313_p5 = scmp.lt.u32.totalorder %s1306_s13, %s1945_s1 }
  0x13   : > { %p1596_p11 = pnand %p1199_p9, %p1951_p1 }
  0x15   : > { %p1308_p13 = pneg %p1596_p11 }
  0x17   : > { %p1309_p0 = pnand %p1308_p13, %p1307_p12 }
  0x19   : > { %p1310_p3 = pneg %p1309_p0 }
  0x1b   : > { %p1315_p7 = pnand %p1313_p5, %p1310_p3 }
  0x1d   : > { %1318 = shalt.err (!%p1315_p7)
}
  0x1e   : > { %s1319_s18 = scalar_lea.vmem %s1589_s7, 2048  ;;  %p1327_p2 = scmp.lt.s32.totalorder %s1589_s7, %s1589_s7 }
  0x1f   : > { %p1320_p9 = scmp.ne.s32.totalorder %s1589_s7, %s1319_s18  ;;  %p1328_p12 = scmp.lt.s32.totalorder %s1319_s18, %s1319_s18 }
  0x21   : > { %p1322_p10 = pnand %p1320_p9, %p1308_p13  ;;  %p1329_p0 = por %p1328_p12, %p1327_p2 }
  0x23   : > { %p1323_p1 = pneg %p1322_p10 }
  0x25   : > { %p1330_p6 = pnand %p1329_p0, %p1323_p1 }
  0x27   : > { %1333 = shalt.err (!%p1330_p6)
}
  0x28   : > { %s1498_s19 = smov 64   ;;  %s1499_s20 = smov 4  }
  0x29   : > { %1202 = dma.hbm_to_vmem [thread:$0]  (!%p1596_p11), %s1945_s1, 2048, %s1589_s7, [#allocation6], %s1498_s19, %s1498_s19, %s1499_s20  }
  0x2a   : > { %s1334_s12 = scalar_lea.hbm %s1947_s3, 2048 }
  0x2b   : > { %p1335_p2 = scmp.ne.s32.totalorder %s1947_s3, %s1334_s12  ;;  %p1341_p10 = scmp.lt.u32.totalorder %s1334_s12, %s1947_s3 }
  0x2d   : > { %p1337_p1 = pnand %p1335_p2, %p1308_p13 }
  0x2f   : > { %p1338_p6 = pneg %p1337_p1 }
  0x31   : > { %p1343_p3 = pnand %p1341_p10, %p1338_p6 }
  0x33   : > { %1346 = shalt.err (!%p1343_p3)
}
  0x34   : > { %s1347_s7 = scalar_lea.vmem %s1600_s10, 2048  ;;  %p1355_p12 = scmp.lt.s32.totalorder %s1600_s10, %s1600_s10 }
  0x35   : > { %p1348_p5 = scmp.ne.s32.totalorder %s1600_s10, %s1347_s7  ;;  %p1356_p0 = scmp.lt.s32.totalorder %s1347_s7, %s1347_s7 }
  0x37   : > { %p1350_p7 = pnand %p1348_p5, %p1308_p13  ;;  %p1357_p2 = por %p1356_p0, %p1355_p12 }
  0x39   : > { %p1351_p9 = pneg %p1350_p7 }
  0x3b   : > { %p1358_p1 = pnand %p1357_p2, %p1351_p9 }
  0x3d   : > { %1361 = shalt.err (!%p1358_p1)
}
  0x3e   : > { %s1500_s17 = smov 128   ;;  %s1501_s18 = smov 8  }
  0x3f   : > { %1205 = dma.hbm_to_vmem [thread:$0]  (!%p1596_p11), %s1947_s3, 2048, %s1600_s10, [#allocation6], %s1500_s17, %s1500_s17, %s1501_s18  }
  0x40   : > { %s1655_s26 = sadd.s32 1, %s1494_s24   ;;  %s34_s9 = sadd.s32 1, %s1490_s23 }
  0x41   : > { %s31_s30 = ssub.s32 %s1494_s24, %s1655_s26  ;;  %p41_p6 = scmp.ne.s32.totalorder %s1490_s23, %s1486_s22 }
  0x42   : > { %p32_p13 = scmp.eq.s32.totalorder %s31_s30, 0  ;;  %p42_p10 = scmp.eq.s32.totalorder %s1494_s24, 0 }
  0x43   : > { %p1958_p5 = scmp.eq.s32.totalorder %s1566_s25, 1  ;;  %p1219_p9 = scmp.lt.s32.totalorder %s1494_s24, 2 }
  0x44   : > { %s1664_s11 = scalar_select %p32_p13, %s1490_s23, %s34_s9  }
  0x45   : > { %p43_p3 = por %p42_p10, %p41_p6  ;;  %p1668_p7 = por %p1958_p5, %p41_p6 }
  0x46   : > { %s239_s8 = sand.u32 1, %s1490_s23   ;;  %s1118_s10 = sshll.u32 %s1494_s24, 12 }
  0x47   : > { %s1959_s12 = scalar_select %p1668_p7, 1, 0 }
  0x48   : > { %s1066_s13 = sshll.u32 %s239_s8, 8  ;;  %s1678_s16 = scalar_lea.hbm %s1944_s0, %s1118_s10 }
  0x49   : > { %s243_s7 = scalar_lea.vmem [#allocation2], %s1066_s13  ;;  %p1682_p11 = pnand %p1219_p9, %p43_p3 }
  0x4a   : > { %s251_s17 = sshll.u32 %s243_s7, 4  ;;  %s1686_s19 = scalar_lea.sflag [#allocation3], %s239_s8  ;;  %s1680_s17 = int_to_ptr.vmem [resolvable:$true] %s251_s17 }
  0x4b   : > { %s1362_s20 = scalar_lea.hbm %s1678_s16, 4096  ;;  %p1364_p0 = pneg %p1682_p11 }
  0x4c   : > { %p1363_p12 = scmp.ne.s32.totalorder %s1678_s16, %s1362_s20  ;;  %s1367_s13 = scalar_lea.hbm %s1944_s0, 8192 }
  0x4d   : > { %p1368_p13 = scmp.lt.u32.totalorder %s1678_s16, %s1944_s0  ;;  %p1369_p6 = scmp.lt.u32.totalorder %s1367_s13, %s1362_s20 }
  0x4e   : > { %p1365_p2 = pnand %p1364_p0, %p1363_p12  ;;  %p1371_p3 = scmp.lt.u32.totalorder %s1362_s20, %s1678_s16 }
  0x4f   : > { %p1370_p10 = por %p1369_p6, %p1368_p13 }
  0x50   : > { %p1366_p1 = pneg %p1365_p2 }
  0x51   : > { %p1372_p5 = por %p1371_p3, %p1370_p10 }
  0x53   : > { %p1373_p9 = pnand %p1372_p5, %p1366_p1 }
  0x55   : > { %1376 = shalt.err (!%p1373_p9)
}
  0x56   : > { %s1377_s8 = scalar_lea.vmem %s1680_s17, 4096  ;;  %s1502_s15 = smov [#allocation2]  }
  0x57   : > { %p1378_p12 = scmp.ne.s32.totalorder %s1680_s17, %s1377_s8  ;;  %s1382_s7 = sshll.u32 %s1502_s15, 4  ;;  %s1383_s7 = int_to_ptr.vmem [resolvable:$false] %s1382_s7 }
  0x58   : > { %s1384_s30 = scalar_lea.vmem %s1383_s7, 8192  ;;  %p1385_p4 = scmp.lt.s32.totalorder %s1680_s17, %s1383_s7 }
  0x59   : > { %p1380_p2 = pnand %p1378_p12, %p1364_p0  ;;  %p1386_p13 = scmp.lt.s32.totalorder %s1384_s30, %s1377_s8 }
  0x5b   : > { %p1381_p7 = pneg %p1380_p2  ;;  %p1387_p6 = por %p1386_p13, %p1385_p4 }
  0x5d   : > { %p1388_p10 = pnand %p1387_p6, %p1381_p7 }
  0x5f   : > { %1391 = shalt.err (!%p1388_p10)
}
  0x60   : > { %s1503_s20 = smov 256   ;;  %s1504_s9 = smov 16  }
  0x61   : > { %1209 = dma.hbm_to_vmem [thread:$0]  (!%p1682_p11), %s1678_s16, 4096, %s1680_s17, %s1686_s19, %s1503_s20, %s1503_s20, %s1504_s9  }
  0x62   : > { %263 = sbr.rel (%p1585_p8) target bundleno = 653 (0x28d), region = 40  ;;  %s1717_s13 = sand.u32 (!%p1585_p8), 1, %s1486_s22  }
  0x63   : > { %s1071_s10 = sshll.u32 (!%p1585_p8), %s1717_s13, 8  ;;  %s266_s14 = scalar_lea.sflag (!%p1585_p8), [#allocation3], %s1717_s13 }
  0x64   : > { %s1723_s8 = scalar_lea.vmem (!%p1585_p8), [#allocation2], %s1071_s10  ;;  %p1961_p4 = scmp.ne.s32.totalorder (!%p1585_p8), %s1954_s27, 0 }
  0x69   : > { %1465 = dma.done.wait (%p1961_p4), %s266_s14, 4096  }
  0x6a   : > { %1467 = vsyncadd (%p1961_p4), %s266_s14, 4294963200  ;;  %p1962_p7 = scmp.eq.s32.totalorder %s1566_s25, 0 }
  0x6c   : > { %1469 = dma.done.wait (%p1962_p7), [#allocation6], 4096   ;;  %p1963_p8 = pmov %p1962_p7 }
  0x6d   : > { %v1266_v0 = vld [vmem:[#allocation5 + $0x40] sm:$0xff]   ;;  %v1268_v2 = vld [vmem:[#allocation5 + $0x48] sm:$0xff]   ;;  %v1270_v4 = vld [vmem:[#allocation5 + $0x50] sm:$0xff]   ;;  %s1075_s16 = sshll.u32 %s1717_s13, 1  ;;  %s1114_s19 = sshll.u32 %s1566_s25, 5 }
  0x6e   : > { %1471 = vsyncadd (%p1963_p8), [#allocation6], 4294963200  ;;  %v1267_v1 = vld [vmem:[#allocation5] sm:$0xff]   ;;  %1121 = vmatprep.subr.bf16.mxu0 %v1266_v0  ;;  %v1269_v3 = vld [vmem:[#allocation5 + $0x8] sm:$0xff]   ;;  %s310_s17 = scalar_lea.vmem [#allocation9], %s1075_s16  ;;  %s938_s30 = scalar_lea.hbm %s1950_s6, %s1114_s19 }
  0x6f   : > { %1122 = vmatpush3.bf16.msra.mxu0 %v1267_v1  ;;  %v1271_v5 = vld [vmem:[#allocation5 + $0x10] sm:$0xff]   ;;  %v1272_v6 = vld [vmem:[#allocation5 + $0x58] sm:$0xff]   ;;  %v1274_v8 = vld [vmem:[#allocation5 + $0x60] sm:$0xff]   ;;  %s940_s18 = sshll.u32 %s310_s17, 4  ;;  %s910_s20 = scalar_lea.sflag [#allocation10], %s1717_s13  ;;  %s1795_s18 = int_to_ptr.vmem [resolvable:$true] %s940_s18 }
  0x70   : > { %1123 = vmatprep.subr.bf16.mxu0 %v1268_v2  ;;  %v1273_v7 = vld [vmem:[#allocation5 + $0x18] sm:$0xff]   ;;  %v1275_v9 = vld [vmem:[#allocation5 + $0x20] sm:$0xff]   ;;  %v1276_v10 = vld [vmem:[#allocation5 + $0x68] sm:$0xff]   ;;  %s1392_s9 = scalar_lea.vmem %s1795_s18, 32  ;;  %p1964_p0 = scmp.ne.s32.totalorder %s1959_s12, 0 }
  0x71   : > { %v315_v11 = vld [vmem:[%s1723_s8 + $0x8] sm:$0xff]  ;;  %v317_v12 = vld [vmem:[%s1723_s8 + $0x18] sm:$0xff]  ;;  %v1278_v15 = vld [vmem:[#allocation5 + $0x70] sm:$0xff]   ;;  %p1393_p11 = scmp.ne.s32.totalorder %s1795_s18, %s1392_s9  ;;  %s1506_s14 = smov [#allocation9]  }
  0x72   : > { %v347_v13 = vpack.c.bf16 %v317_v12, %v315_v11  ;;  %v1277_v14 = vld [vmem:[#allocation5 + $0x28] sm:$0xff]   ;;  %v1279_v16 = vld [vmem:[#allocation5 + $0x30] sm:$0xff]   ;;  %v1280_v17 = vld [vmem:[#allocation5 + $0x78] sm:$0xff]  }
  0x73   : > { %1124 = vmatpush3.bf16.msra.mxu0 %v1269_v3  ;;  %v1281_v18 = vld [vmem:[#allocation5 + $0x38] sm:$0xff]   ;;  %v314_v19 = vld [vmem:[%s1723_s8] sm:$0xff]  ;;  %v316_v20 = vld [vmem:[%s1723_s8 + $0x10] sm:$0xff]  ;;  %p1394_p1 = pnand %p1393_p11, %p1964_p0 }
  0x74   : > { %1125 = vmatprep.subr.bf16.mxu0 %v1270_v4  ;;  %529 = vmatprep.mubr.bf16.mxu0 %v347_v13  ;;  %v319_v21 = vld [vmem:[%s1723_s8 + $0x28] sm:$0xff]  ;;  %v321_v22 = vld [vmem:[%s1723_s8 + $0x38] sm:$0xff]  ;;  %v346_v26 = vpack.c.bf16 %v316_v20, %v314_v19  ;;  %v318_v30 = vld [vmem:[%s1723_s8 + $0x20] sm:$0xff] }
  0x75   : > { %v1282_v23 = vld [vmem:[#allocation7 + $0x4] ss:$8 sps:$4 sm:$0xff]   ;;  %v1284_v24 = vld [vmem:[#allocation7] ss:$8 sps:$4 sm:$0xff]   ;;  %v1285_v25 = vld [vmem:[#allocation7 + $0x14] ss:$8 sps:$4 sm:$0xff]   ;;  %v349_v28 = vpack.c.bf16 %v321_v22, %v319_v21  ;;  %p1395_p3 = pneg %p1394_p1 }
  0x76   : > { %726 = vmatprep.subr.bf16.mxu1 %v1282_v23  ;;  %v1287_v27 = vld [vmem:[#allocation7 + $0x10] ss:$8 sps:$4 sm:$0xff]   ;;  %v1288_v29 = vld [vmem:[#allocation7 + $0x24] ss:$8 sps:$4 sm:$0xff]   ;;  %v1290_v31 = vld [vmem:[#allocation7 + $0x20] ss:$8 sps:$4 sm:$0xff]  }
  0x77   : > { %1126 = vmatpush3.bf16.msra.mxu0 %v1271_v5  ;;  %727 = vmatpush1.bf16.msra.mxu1 %v1284_v24  ;;  %v320_v32 = vld [vmem:[%s1723_s8 + $0x30] sm:$0xff]  ;;  %v323_v34 = vld [vmem:[%s1723_s8 + $0x48] sm:$0xff]  ;;  %v325_v35 = vld [vmem:[%s1723_s8 + $0x58] sm:$0xff] }
  0x78   : > { %1127 = vmatprep.subr.bf16.mxu0 %v1272_v6  ;;  %728 = vmatprep.subr.bf16.mxu1 %v1285_v25  ;;  %v1291_v33 = vld [vmem:[#allocation7 + $0x34] ss:$8 sps:$4 sm:$0xff]   ;;  %v348_v36 = vpack.c.bf16 %v320_v32, %v318_v30  ;;  %v1293_v37 = vld [vmem:[#allocation7 + $0x30] ss:$8 sps:$4 sm:$0xff]   ;;  %v351_v38 = vpack.c.bf16 %v325_v35, %v323_v34  ;;  %v1294_v39 = vld [vmem:[#allocation7 + $0x44] ss:$8 sps:$4 sm:$0xff]  }
  0x79   : > { %v1296_v40 = vld [vmem:[#allocation7 + $0x40] ss:$8 sps:$4 sm:$0xff]   ;;  %v324_v42 = vld [vmem:[%s1723_s8 + $0x50] sm:$0xff]  ;;  %v329_v44 = vld [vmem:[%s1723_s8 + $0x78] sm:$0xff] }
  0x7a   : > { %v322_v41 = vld [vmem:[%s1723_s8 + $0x40] sm:$0xff]  ;;  %v327_v43 = vld [vmem:[%s1723_s8 + $0x68] sm:$0xff]  ;;  %v328_v48 = vld [vmem:[%s1723_s8 + $0x70] sm:$0xff] }
  0x7b   : > { %1128 = vmatpush3.bf16.msra.mxu0 %v1273_v7  ;;  %729 = vmatpush1.bf16.msra.mxu1 %v1287_v27  ;;  %v350_v45 = vpack.c.bf16 %v324_v42, %v322_v41  ;;  %v353_v46 = vpack.c.bf16 %v329_v44, %v327_v43  ;;  %v326_v47 = vld [vmem:[%s1723_s8 + $0x60] sm:$0xff]  ;;  %v331_v49 = vld [vmem:[%s1723_s8 + $0x88] sm:$0xff]  ;;  %v333_v50 = vld [vmem:[%s1723_s8 + $0x98] sm:$0xff] }
  0x7c   : > { %1129 = vmatprep.subr.bf16.mxu0 %v1274_v8  ;;  %730 = vmatprep.subr.bf16.mxu1 %v1288_v29  ;;  %v352_v51 = vpack.c.bf16 %v328_v48, %v326_v47  ;;  %v355_v52 = vpack.c.bf16 %v333_v50, %v331_v49  ;;  %v330_v53 = vld [vmem:[%s1723_s8 + $0x80] sm:$0xff]  ;;  %v332_v54 = vld [vmem:[%s1723_s8 + $0x90] sm:$0xff]  ;;  %v335_v55 = vld [vmem:[%s1723_s8 + $0xa8] sm:$0xff] }
  0x7d   : > { %v337_v56 = vld [vmem:[%s1723_s8 + $0xb8] sm:$0xff]  ;;  %v354_v57 = vpack.c.bf16 %v332_v54, %v330_v53  ;;  %v334_v59 = vld [vmem:[%s1723_s8 + $0xa0] sm:$0xff]  ;;  %v336_v60 = vld [vmem:[%s1723_s8 + $0xb0] sm:$0xff] }
  0x7e   : > { %v357_v58 = vpack.c.bf16 %v337_v56, %v335_v55  ;;  %v339_v61 = vld [vmem:[%s1723_s8 + $0xc8] sm:$0xff]  ;;  %v341_v62 = vld [vmem:[%s1723_s8 + $0xd8] sm:$0xff]  ;;  %v356_v63 = vpack.c.bf16 %v336_v60, %v334_v59  ;;  %v338_v1 = vld [vmem:[%s1723_s8 + $0xc0] sm:$0xff] }
  0x7f   : > { %1130 = vmatpush3.bf16.msra.mxu0 %v1275_v9  ;;  %731 = vmatpush1.bf16.msra.mxu1 %v1290_v31  ;;  %v359_v0 = vpack.c.bf16 %v341_v62, %v339_v61  ;;  %v340_v2 = vld [vmem:[%s1723_s8 + $0xd0] sm:$0xff]  ;;  %v343_v3 = vld [vmem:[%s1723_s8 + $0xe8] sm:$0xff]  ;;  %v345_v4 = vld [vmem:[%s1723_s8 + $0xf8] sm:$0xff] }
  0x80   : > { %1131 = vmatprep.subr.bf16.mxu0 %v1276_v10  ;;  %732 = vmatprep.subr.bf16.mxu1 %v1291_v33  ;;  %v358_v5 = vpack.c.bf16 %v340_v2, %v338_v1  ;;  %v361_v6 = vpack.c.bf16 %v345_v4, %v343_v3  ;;  %v342_v7 = vld [vmem:[%s1723_s8 + $0xe0] sm:$0xff]  ;;  %v344_v8 = vld [vmem:[%s1723_s8 + $0xf0] sm:$0xff]  ;;  %s1396_s8 = sshll.u32 %s1506_s14, 4  ;;  %s1397_s8 = int_to_ptr.vmem [resolvable:$false] %s1396_s8 }
  0x81   : > { %v360_v9 = vpack.c.bf16 %v344_v8, %v342_v7  ;;  %v1297_v10 = vld [vmem:[#allocation7 + $0x54] ss:$8 sps:$4 sm:$0xff]   ;;  %v1299_v11 = vld [vmem:[#allocation7 + $0x50] ss:$8 sps:$4 sm:$0xff]   ;;  %v1300_v12 = vld [vmem:[#allocation7 + $0x64] ss:$8 sps:$4 sm:$0xff]   ;;  %p1399_p5 = scmp.lt.s32.totalorder %s1795_s18, %s1397_s8 }
  0x82   : > { %v1302_v13 = vld [vmem:[#allocation7 + $0x60] ss:$8 sps:$4 sm:$0xff]   ;;  %s1398_s27 = scalar_lea.vmem %s1397_s8, 64 }
  0x83   : > { %1132 = vmatpush3.bf16.msra.mxu0 %v1277_v14  ;;  %733 = vmatpush1.bf16.msra.mxu1 %v1293_v37  ;;  %v1303_v14 = vld [vmem:[#allocation7 + $0x74] ss:$8 sps:$4 sm:$0xff]   ;;  %v1769_v19 = vld [vmem:[%s1946_s2] ss:$0 sm:$0xff]  ;;  %p1400_p9 = scmp.lt.s32.totalorder %s1398_s27, %s1392_s9 }
  0x84   : > { %1133 = vmatprep.subr.bf16.mxu0 %v1278_v15  ;;  %734 = vmatprep.subr.bf16.mxu1 %v1294_v39  ;;  %v1305_v15 = vld [vmem:[#allocation7 + $0x70] ss:$8 sps:$4 sm:$0xff]  }
  0x85   : > { %p1401_p12 = por %p1400_p9, %p1399_p5 }
  0x87   : > { %1134 = vmatpush3.bf16.msra.mxu0 %v1279_v16  ;;  %735 = vmatpush1.bf16.msra.mxu1 %v1296_v40  ;;  %v1505_v16 = vmov 0   ;;  %p1402_p2 = pnand %p1401_p12, %p1395_p3 }
  0x88   : > { %1135 = vmatprep.subr.bf16.mxu0 %v1280_v17  ;;  %736 = vmatprep.subr.bf16.mxu1 %v1297_v10 }
  0x89   : > { %758 = vmatprep.mubr.bf16.mxu1 %v1505_v16 }
  0x8b   : > { %1136 = vmatpush3.bf16.msra.mxu0 %v1281_v18  ;;  %737 = vmatpush1.bf16.msra.mxu1 %v1299_v11 }
  0x8c   : > { %738 = vmatprep.subr.bf16.mxu1 %v1300_v12 }
  0x8e   : > { %530 = vmatmul.mubr.bf16.vlgmr.msra.gmra.mrb[0].mxu0 %v346_v26 }
  0x8f   : > { %537 = vmatprep.mubr.bf16.mxu0 %v349_v28  ;;  %739 = vmatpush1.bf16.msra.mxu1 %v1302_v13 }
  0x90   : > { %740 = vmatprep.subr.bf16.mxu1 %v1303_v14 }
  0x93   : > { %741 = vmatpush1.bf16.msra.mxu1 %v1305_v15 }
  0x96   : > { %538 = vmatmul.mubr.bf16.gmra.mrb[4].mxu0 %v348_v36 }
  0x97   : > { %545 = vmatprep.mubr.bf16.mxu0 %v351_v38 }
  0x9e   : > { %546 = vmatmul.mubr.bf16.gmra.mrb[8].mxu0 %v350_v45 }
  0x9f   : > { %553 = vmatprep.mubr.bf16.mxu0 %v353_v46 }
  0xa6   : > { %554 = vmatmul.mubr.bf16.gmra.mrb[12].mxu0 %v352_v51 }
  0xa7   : > { %561 = vmatprep.mubr.bf16.mxu0 %v355_v52 }
  0xae   : > { %562 = vmatmul.mubr.bf16.gmra.mrb[16].mxu0 %v354_v57 }
  0xaf   : > { %569 = vmatprep.mubr.bf16.mxu0 %v357_v58 }
  0xb6   : > { %570 = vmatmul.mubr.bf16.gmra.mrb[20].mxu0 %v356_v63 }
  0xb7   : > { %577 = vmatprep.mubr.bf16.mxu0 %v359_v0 }
  0xbe   : > { %578 = vmatmul.mubr.bf16.gmra.mrb[24].mxu0 %v358_v5 }
  0xbf   : > { %585 = vmatprep.mubr.bf16.mxu0 %v361_v6 }
  0xc6   : > { %586 = vmatmul.mubr.bf16.gmra.mrb[28].mxu0 %v360_v9 }
 0x161   : > { %v1137_v17 = vpop.f32.mrb[0].mxu0 }
 0x162   : > { %v1138_v18 = vpop.f32.mrb[1].mxu0 }
 0x163   : > { %v1139_v20 = vadd.f32 %v1138_v18, %v1137_v17  ;;  %v1140_v21 = vpop.f32.mrb[2].mxu0 }
 0x164   : > { %v1141_v22 = vpop.f32.mrb[3].mxu0 }
 0x165   : > { %v1142_v23 = vadd.f32 %v1141_v22, %v1140_v21  ;;  %v532_v24 = vadd.f32 %v1139_v20, %v1769_v19 }
 0x167   : > { %v535_v25 = vadd.f32 %v1142_v23, %v1769_v19  ;;  %v594_v26 = vmax.f32 %v532_v24, 0.0 }
 0x169   : > { %v595_v27 = vmax.f32 %v535_v25, 0.0  ;;  %v1143_v28 = vpop.f32.mrb[4].mxu0  ;;  %871 = vxpose.xlu0.b32.start [1/16] (narrow) %v594_v26, 8 }
 0x16a   : > { %v1144_v29 = vpop.f32.mrb[5].mxu0 }
 0x16b   : > { %v610_v30 = vpack.c.bf16 %v595_v27, %v594_v26  ;;  %v1145_v31 = vadd.f32 %v1144_v29, %v1143_v28  ;;  %v1146_v32 = vpop.f32.mrb[6].mxu0 }
 0x16c   : > { %v1147_v33 = vpop.f32.mrb[7].mxu0 }
 0x16d   : > { %v1148_v34 = vadd.f32 %v1147_v33, %v1146_v32  ;;  %759 = vmatmul.mubr.bf16.vlgmr.msra.gmra.mrb[0].mxu1 %v610_v30  ;;  %872 = vxpose.xlu0.b32.cont [2/16] (narrow) %v595_v27, 8  ;;  %v540_v35 = vadd.f32 %v1145_v31, %v1769_v19 }
 0x16e   : > { %768 = vmatprep.mubr.bf16.mxu1 %v1505_v16 }
 0x16f   : > { %v543_v36 = vadd.f32 %v1148_v34, %v1769_v19  ;;  %v596_v37 = vmax.f32 %v540_v35, 0.0 }
 0x171   : > { %v597_v38 = vmax.f32 %v543_v36, 0.0  ;;  %v1149_v39 = vpop.f32.mrb[8].mxu0  ;;  %873 = vxpose.xlu0.b32.cont [3/16] (narrow) %v596_v37, 8 }
 0x172   : > { %v1150_v40 = vpop.f32.mrb[9].mxu0 }
 0x173   : > { %v611_v41 = vpack.c.bf16 %v597_v38, %v596_v37  ;;  %v1151_v42 = vadd.f32 %v1150_v40, %v1149_v39  ;;  %v1152_v43 = vpop.f32.mrb[10].mxu0 }
 0x174   : > { %v1153_v44 = vpop.f32.mrb[11].mxu0 }
 0x175   : > { %v1154_v45 = vadd.f32 %v1153_v44, %v1152_v43  ;;  %769 = vmatmul.mubr.bf16.gmra.mrb[4].mxu1 %v611_v41  ;;  %874 = vxpose.xlu0.b32.cont [4/16] (narrow) %v597_v38, 8  ;;  %v548_v46 = vadd.f32 %v1151_v42, %v1769_v19 }
 0x176   : > { %778 = vmatprep.mubr.bf16.mxu1 %v1505_v16 }
 0x177   : > { %v551_v47 = vadd.f32 %v1154_v45, %v1769_v19  ;;  %v598_v48 = vmax.f32 %v548_v46, 0.0 }
 0x179   : > { %v599_v49 = vmax.f32 %v551_v47, 0.0  ;;  %v1155_v50 = vpop.f32.mrb[12].mxu0  ;;  %875 = vxpose.xlu0.b32.cont [5/16] (narrow) %v598_v48, 8 }
 0x17a   : > { %v1156_v51 = vpop.f32.mrb[13].mxu0 }
 0x17b   : > { %v612_v52 = vpack.c.bf16 %v599_v49, %v598_v48  ;;  %v1157_v53 = vadd.f32 %v1156_v51, %v1155_v50  ;;  %v1158_v54 = vpop.f32.mrb[14].mxu0 }
 0x17c   : > { %v1159_v55 = vpop.f32.mrb[15].mxu0 }
 0x17d   : > { %v1160_v56 = vadd.f32 %v1159_v55, %v1158_v54  ;;  %779 = vmatmul.mubr.bf16.gmra.mrb[8].mxu1 %v612_v52  ;;  %876 = vxpose.xlu0.b32.cont [6/16] (narrow) %v599_v49, 8  ;;  %v556_v57 = vadd.f32 %v1157_v53, %v1769_v19 }
 0x17e   : > { %788 = vmatprep.mubr.bf16.mxu1 %v1505_v16 }
 0x17f   : > { %v559_v58 = vadd.f32 %v1160_v56, %v1769_v19  ;;  %v600_v59 = vmax.f32 %v556_v57, 0.0 }
 0x181   : > { %v601_v60 = vmax.f32 %v559_v58, 0.0  ;;  %v1161_v61 = vpop.f32.mrb[16].mxu0  ;;  %877 = vxpose.xlu0.b32.cont [7/16] (narrow) %v600_v59, 8 }
 0x182   : > { %v1162_v62 = vpop.f32.mrb[17].mxu0 }
 0x183   : > { %v613_v63 = vpack.c.bf16 %v601_v60, %v600_v59  ;;  %v1163_v0 = vadd.f32 %v1162_v62, %v1161_v61  ;;  %v1164_v1 = vpop.f32.mrb[18].mxu0 }
 0x184   : > { %v1165_v2 = vpop.f32.mrb[19].mxu0 }
 0x185   : > { %v1166_v3 = vadd.f32 %v1165_v2, %v1164_v1  ;;  %789 = vmatmul.mubr.bf16.gmra.mrb[12].mxu1 %v613_v63  ;;  %878 = vxpose.xlu0.b32.cont [8/16] (narrow) %v601_v60, 8  ;;  %v564_v4 = vadd.f32 %v1163_v0, %v1769_v19 }
 0x186   : > { %798 = vmatprep.mubr.bf16.mxu1 %v1505_v16 }
 0x187   : > { %v567_v5 = vadd.f32 %v1166_v3, %v1769_v19  ;;  %v602_v6 = vmax.f32 %v564_v4, 0.0 }
 0x189   : > { %v603_v7 = vmax.f32 %v567_v5, 0.0  ;;  %v1167_v8 = vpop.f32.mrb[20].mxu0  ;;  %879 = vxpose.xlu0.b32.cont [9/16] (narrow) %v602_v6, 8 }
 0x18a   : > { %v1168_v9 = vpop.f32.mrb[21].mxu0 }
 0x18b   : > { %v614_v10 = vpack.c.bf16 %v603_v7, %v602_v6  ;;  %v1169_v11 = vadd.f32 %v1168_v9, %v1167_v8  ;;  %v1170_v12 = vpop.f32.mrb[22].mxu0 }
 0x18c   : > { %v1171_v13 = vpop.f32.mrb[23].mxu0 }
 0x18d   : > { %v1172_v14 = vadd.f32 %v1171_v13, %v1170_v12  ;;  %799 = vmatmul.mubr.bf16.gmra.mrb[16].mxu1 %v614_v10  ;;  %880 = vxpose.xlu0.b32.cont [10/16] (narrow) %v603_v7, 8  ;;  %v572_v15 = vadd.f32 %v1169_v11, %v1769_v19 }
 0x18e   : > { %808 = vmatprep.mubr.bf16.mxu1 %v1505_v16 }
 0x18f   : > { %v575_v17 = vadd.f32 %v1172_v14, %v1769_v19  ;;  %v604_v18 = vmax.f32 %v572_v15, 0.0 }
 0x191   : > { %v605_v20 = vmax.f32 %v575_v17, 0.0  ;;  %v1173_v21 = vpop.f32.mrb[24].mxu0  ;;  %881 = vxpose.xlu0.b32.cont [11/16] (narrow) %v604_v18, 8 }
 0x192   : > { %v1174_v22 = vpop.f32.mrb[25].mxu0 }
 0x193   : > { %v615_v23 = vpack.c.bf16 %v605_v20, %v604_v18  ;;  %v1175_v24 = vadd.f32 %v1174_v22, %v1173_v21  ;;  %v1176_v25 = vpop.f32.mrb[26].mxu0 }
 0x194   : > { %v1177_v26 = vpop.f32.mrb[27].mxu0 }
 0x195   : > { %v1178_v27 = vadd.f32 %v1177_v26, %v1176_v25  ;;  %809 = vmatmul.mubr.bf16.gmra.mrb[20].mxu1 %v615_v23  ;;  %882 = vxpose.xlu0.b32.cont [12/16] (narrow) %v605_v20, 8  ;;  %v580_v28 = vadd.f32 %v1175_v24, %v1769_v19 }
 0x196   : > { %818 = vmatprep.mubr.bf16.mxu1 %v1505_v16 }
 0x197   : > { %v583_v29 = vadd.f32 %v1178_v27, %v1769_v19  ;;  %v606_v30 = vmax.f32 %v580_v28, 0.0 }
 0x199   : > { %v607_v31 = vmax.f32 %v583_v29, 0.0  ;;  %v1179_v32 = vpop.f32.mrb[28].mxu0  ;;  %883 = vxpose.xlu0.b32.cont [13/16] (narrow) %v606_v30, 8 }
 0x19a   : > { %v1180_v33 = vpop.f32.mrb[29].mxu0 }
 0x19b   : > { %v616_v34 = vpack.c.bf16 %v607_v31, %v606_v30  ;;  %v1181_v35 = vadd.f32 %v1180_v33, %v1179_v32  ;;  %v1182_v36 = vpop.f32.mrb[30].mxu0 }
 0x19c   : > { %v1183_v37 = vpop.f32.mrb[31].mxu0 }
 0x19d   : > { %v1184_v38 = vadd.f32 %v1183_v37, %v1182_v36  ;;  %819 = vmatmul.mubr.bf16.gmra.mrb[24].mxu1 %v616_v34  ;;  %884 = vxpose.xlu0.b32.cont [14/16] (narrow) %v607_v31, 8  ;;  %v588_v39 = vadd.f32 %v1181_v35, %v1769_v19 }
 0x19e   : > { %828 = vmatprep.mubr.bf16.mxu1 %v1505_v16 }
 0x19f   : > { %v591_v40 = vadd.f32 %v1184_v38, %v1769_v19  ;;  %v608_v41 = vmax.f32 %v588_v39, 0.0 }
 0x1a1   : > { %v609_v42 = vmax.f32 %v591_v40, 0.0  ;;  %885 = vxpose.xlu0.b32.cont [15/16] (narrow) %v608_v41, 8 }
 0x1a3   : > { %v617_v43 = vpack.c.bf16 %v609_v42, %v608_v41 }
 0x1a5   : > { %829 = vmatmul.mubr.bf16.gmra.mrb[28].mxu1 %v617_v43  ;;  %886 = vxpose.xlu0.b32.end [16/16] (narrow) %v609_v42, 8 }
 0x1e9   : > { %v887_v44 = vpop.trf.xlu0 }
 0x1ea   : > { %903 = vst [vmem:[%s310_s17] sm:$0x3] %v887_v44 }
 0x1eb   : > { %1405 = shalt.err (!%p1402_p2)
}
 0x1ec   : > { %s1406_s29 = scalar_lea.hbm %s938_s30, 32  ;;  %s1410_s19 = scalar_lea.hbm %s1950_s6, 64 }
 0x1ed   : > { %p1407_p13 = scmp.ne.s32.totalorder %s938_s30, %s1406_s29  ;;  %p1411_p4 = scmp.lt.u32.totalorder %s938_s30, %s1950_s6 }
 0x1ee   : > { %p1412_p7 = scmp.lt.u32.totalorder %s1410_s19, %s1406_s29  ;;  %p1414_p11 = scmp.lt.u32.totalorder %s1406_s29, %s938_s30 }
 0x1ef   : > { %p1408_p6 = pnand %p1407_p13, %p1964_p0 }
 0x1f0   : > { %p1413_p8 = por %p1412_p7, %p1411_p4 }
 0x1f1   : > { %p1409_p10 = pneg %p1408_p6 }
 0x1f2   : > { %p1415_p1 = por %p1414_p11, %p1413_p8 }
 0x1f4   : > { %p1416_p3 = pnand %p1415_p1, %p1409_p10 }
 0x1f6   : > { %1419 = shalt.err (!%p1416_p3)
}
 0x1f7   : > { %1196 = dma.vmem_to_hbm [thread:$0]  (%p1964_p0), %s1795_s18, 32, %s938_s30, %s910_s20   ;;  %v636_v16 = vlaneseq  ;;  %v634_v46 = vld [vmem:[%s1948_s4] sm:$0x3] }
 0x1f8   : > { %s1829_s18 = scalar_lea.vmem [#allocation8], %s1071_s10  ;;  %s1120_s10 = sshll.u32 %s1566_s25, 12 }
 0x1f9   : > { %v637_v19 = vshrl.u32 %v636_v16, 7  ;;  %s924_s30 = sshll.u32 %s1829_s18, 4  ;;  %s1894_s27 = scalar_lea.hbm %s1949_s5, %s1120_s10  ;;  %s1896_s30 = int_to_ptr.vmem [resolvable:$true] %s924_s30 }
 0x1fa   : > { %s905_s25 = scalar_lea.sflag [#allocation4], %s1717_s13  ;;  %s1420_s29 = scalar_lea.vmem %s1896_s30, 4096 }
 0x1fb   : > { %v638_v45 = vsub.s32 0, %v637_v19  ;;  %v642_v47 = vsub.s32 1, %v637_v19  ;;  %p1421_p5 = scmp.ne.s32.totalorder %s1896_s30, %s1420_s29  ;;  %s1507_s16 = smov [#allocation8]  }
 0x1fc   : > { %s1424_s17 = sshll.u32 %s1507_s16, 4  ;;  %s1425_s17 = int_to_ptr.vmem [resolvable:$false] %s1424_s17 }
 0x1fd   : > { %v1821_v48 = vrot.slane %v634_v46, %v638_v45  ;;  %v1823_v49 = vrot.slane %v634_v46, %v642_v47  ;;  %p1422_p9 = pnand %p1421_p5, %p1964_p0  ;;  %s1426_s19 = scalar_lea.vmem %s1425_s17, 8192 }
 0x1fe   : > { %p1427_p2 = scmp.lt.s32.totalorder %s1896_s30, %s1425_s17  ;;  %p1428_p13 = scmp.lt.s32.totalorder %s1426_s19, %s1420_s29 }
 0x1ff   : > { %p1423_p12 = pneg %p1422_p9 }
 0x200   : > { %p1429_p6 = por %p1428_p13, %p1427_p2 }
 0x202   : > { %p1430_p10 = pnand %p1429_p6, %p1423_p12 }
 0x240   : > { %v760_v50 = vpop.f32.mrb[0].mxu1 }
 0x241   : > { %v761_v51 = vadd.f32 %v760_v50, %v1821_v48  ;;  %v762_v52 = vpop.f32.mrb[1].mxu1 }
 0x242   : > { %v763_v53 = vadd.f32 %v762_v52, %v1823_v49  ;;  %v764_v54 = vpop.f32.mrb[2].mxu1 }
 0x243   : > { %839 = vst [vmem:[%s1829_s18] sm:$0xff] %v761_v51  ;;  %v765_v55 = vadd.f32 %v764_v54, %v1821_v48  ;;  %v766_v56 = vpop.f32.mrb[3].mxu1 }
 0x244   : > { %840 = vst [vmem:[%s1829_s18 + $0x8] sm:$0xff] %v763_v53  ;;  %v767_v57 = vadd.f32 %v766_v56, %v1823_v49 }
 0x245   : > { %841 = vst [vmem:[%s1829_s18 + $0x10] sm:$0xff] %v765_v55 }
 0x246   : > { %842 = vst [vmem:[%s1829_s18 + $0x18] sm:$0xff] %v767_v57 }
 0x248   : > { %v770_v58 = vpop.f32.mrb[4].mxu1 }
 0x249   : > { %v771_v59 = vadd.f32 %v770_v58, %v1821_v48  ;;  %v772_v60 = vpop.f32.mrb[5].mxu1 }
 0x24a   : > { %v773_v61 = vadd.f32 %v772_v60, %v1823_v49  ;;  %v774_v62 = vpop.f32.mrb[6].mxu1 }
 0x24b   : > { %843 = vst [vmem:[%s1829_s18 + $0x20] sm:$0xff] %v771_v59  ;;  %v775_v63 = vadd.f32 %v774_v62, %v1821_v48  ;;  %v776_v0 = vpop.f32.mrb[7].mxu1 }
 0x24c   : > { %844 = vst [vmem:[%s1829_s18 + $0x28] sm:$0xff] %v773_v61  ;;  %v777_v1 = vadd.f32 %v776_v0, %v1823_v49 }
 0x24d   : > { %845 = vst [vmem:[%s1829_s18 + $0x30] sm:$0xff] %v775_v63 }
 0x24e   : > { %846 = vst [vmem:[%s1829_s18 + $0x38] sm:$0xff] %v777_v1 }
 0x250   : > { %v780_v2 = vpop.f32.mrb[8].mxu1 }
 0x251   : > { %v781_v3 = vadd.f32 %v780_v2, %v1821_v48  ;;  %v782_v4 = vpop.f32.mrb[9].mxu1 }
 0x252   : > { %v783_v5 = vadd.f32 %v782_v4, %v1823_v49  ;;  %v784_v6 = vpop.f32.mrb[10].mxu1 }
 0x253   : > { %847 = vst [vmem:[%s1829_s18 + $0x40] sm:$0xff] %v781_v3  ;;  %v785_v7 = vadd.f32 %v784_v6, %v1821_v48  ;;  %v786_v8 = vpop.f32.mrb[11].mxu1 }
 0x254   : > { %848 = vst [vmem:[%s1829_s18 + $0x48] sm:$0xff] %v783_v5  ;;  %v787_v9 = vadd.f32 %v786_v8, %v1823_v49 }
 0x255   : > { %849 = vst [vmem:[%s1829_s18 + $0x50] sm:$0xff] %v785_v7 }
 0x256   : > { %850 = vst [vmem:[%s1829_s18 + $0x58] sm:$0xff] %v787_v9 }
 0x258   : > { %v790_v10 = vpop.f32.mrb[12].mxu1 }
 0x259   : > { %v791_v11 = vadd.f32 %v790_v10, %v1821_v48  ;;  %v792_v12 = vpop.f32.mrb[13].mxu1 }
 0x25a   : > { %v793_v13 = vadd.f32 %v792_v12, %v1823_v49  ;;  %v794_v14 = vpop.f32.mrb[14].mxu1 }
 0x25b   : > { %851 = vst [vmem:[%s1829_s18 + $0x60] sm:$0xff] %v791_v11  ;;  %v795_v15 = vadd.f32 %v794_v14, %v1821_v48  ;;  %v796_v17 = vpop.f32.mrb[15].mxu1 }
 0x25c   : > { %852 = vst [vmem:[%s1829_s18 + $0x68] sm:$0xff] %v793_v13  ;;  %v797_v18 = vadd.f32 %v796_v17, %v1823_v49 }
 0x25d   : > { %853 = vst [vmem:[%s1829_s18 + $0x70] sm:$0xff] %v795_v15 }
 0x25e   : > { %854 = vst [vmem:[%s1829_s18 + $0x78] sm:$0xff] %v797_v18 }
 0x260   : > { %v800_v20 = vpop.f32.mrb[16].mxu1 }
 0x261   : > { %v801_v21 = vadd.f32 %v800_v20, %v1821_v48  ;;  %v802_v22 = vpop.f32.mrb[17].mxu1 }
 0x262   : > { %v803_v23 = vadd.f32 %v802_v22, %v1823_v49  ;;  %v804_v24 = vpop.f32.mrb[18].mxu1 }
 0x263   : > { %855 = vst [vmem:[%s1829_s18 + $0x80] sm:$0xff] %v801_v21  ;;  %v805_v25 = vadd.f32 %v804_v24, %v1821_v48  ;;  %v806_v26 = vpop.f32.mrb[19].mxu1 }
 0x264   : > { %856 = vst [vmem:[%s1829_s18 + $0x88] sm:$0xff] %v803_v23  ;;  %v807_v27 = vadd.f32 %v806_v26, %v1823_v49 }
 0x265   : > { %857 = vst [vmem:[%s1829_s18 + $0x90] sm:$0xff] %v805_v25 }
 0x266   : > { %858 = vst [vmem:[%s1829_s18 + $0x98] sm:$0xff] %v807_v27 }
 0x268   : > { %v810_v28 = vpop.f32.mrb[20].mxu1 }
 0x269   : > { %v811_v29 = vadd.f32 %v810_v28, %v1821_v48  ;;  %v812_v30 = vpop.f32.mrb[21].mxu1 }
 0x26a   : > { %v813_v31 = vadd.f32 %v812_v30, %v1823_v49  ;;  %v814_v32 = vpop.f32.mrb[22].mxu1 }
 0x26b   : > { %859 = vst [vmem:[%s1829_s18 + $0xa0] sm:$0xff] %v811_v29  ;;  %v815_v33 = vadd.f32 %v814_v32, %v1821_v48  ;;  %v816_v34 = vpop.f32.mrb[23].mxu1 }
 0x26c   : > { %860 = vst [vmem:[%s1829_s18 + $0xa8] sm:$0xff] %v813_v31  ;;  %v817_v35 = vadd.f32 %v816_v34, %v1823_v49 }
 0x26d   : > { %861 = vst [vmem:[%s1829_s18 + $0xb0] sm:$0xff] %v815_v33 }
 0x26e   : > { %862 = vst [vmem:[%s1829_s18 + $0xb8] sm:$0xff] %v817_v35 }
 0x270   : > { %v820_v36 = vpop.f32.mrb[24].mxu1 }
 0x271   : > { %v821_v37 = vadd.f32 %v820_v36, %v1821_v48  ;;  %v822_v38 = vpop.f32.mrb[25].mxu1 }
 0x272   : > { %v823_v39 = vadd.f32 %v822_v38, %v1823_v49  ;;  %v824_v40 = vpop.f32.mrb[26].mxu1 }
 0x273   : > { %863 = vst [vmem:[%s1829_s18 + $0xc0] sm:$0xff] %v821_v37  ;;  %v825_v41 = vadd.f32 %v824_v40, %v1821_v48  ;;  %v826_v42 = vpop.f32.mrb[27].mxu1 }
 0x274   : > { %864 = vst [vmem:[%s1829_s18 + $0xc8] sm:$0xff] %v823_v39  ;;  %v827_v43 = vadd.f32 %v826_v42, %v1823_v49 }
 0x275   : > { %865 = vst [vmem:[%s1829_s18 + $0xd0] sm:$0xff] %v825_v41 }
 0x276   : > { %866 = vst [vmem:[%s1829_s18 + $0xd8] sm:$0xff] %v827_v43 }
 0x278   : > { %v830_v44 = vpop.f32.mrb[28].mxu1 }
 0x279   : > { %v831_v16 = vadd.f32 %v830_v44, %v1821_v48  ;;  %v832_v19 = vpop.f32.mrb[29].mxu1 }
 0x27a   : > { %v833_v45 = vadd.f32 %v832_v19, %v1823_v49  ;;  %v834_v46 = vpop.f32.mrb[30].mxu1 }
 0x27b   : > { %867 = vst [vmem:[%s1829_s18 + $0xe0] sm:$0xff] %v831_v16  ;;  %v835_v47 = vadd.f32 %v834_v46, %v1821_v48  ;;  %v836_v50 = vpop.f32.mrb[31].mxu1 }
 0x27c   : > { %868 = vst [vmem:[%s1829_s18 + $0xe8] sm:$0xff] %v833_v45  ;;  %v837_v51 = vadd.f32 %v836_v50, %v1823_v49 }
 0x27d   : > { %869 = vst [vmem:[%s1829_s18 + $0xf0] sm:$0xff] %v835_v47 }
 0x27e   : > { %870 = vst [vmem:[%s1829_s18 + $0xf8] sm:$0xff] %v837_v51 }
 0x27f   : > { %1433 = shalt.err (!%p1430_p10)
}
 0x280   : > { %s1434_s15 = scalar_lea.hbm %s1894_s27, 4096  ;;  %s1438_s14 = scalar_lea.hbm %s1949_s5, 8192 }
 0x281   : > { %p1435_p4 = scmp.ne.s32.totalorder %s1894_s27, %s1434_s15  ;;  %p1439_p11 = scmp.lt.u32.totalorder %s1894_s27, %s1949_s5 }
 0x282   : > { %p1440_p1 = scmp.lt.u32.totalorder %s1438_s14, %s1434_s15  ;;  %p1442_p5 = scmp.lt.u32.totalorder %s1434_s15, %s1894_s27 }
 0x283   : > { %p1436_p7 = pnand %p1435_p4, %p1964_p0 }
 0x284   : > { %p1441_p3 = por %p1440_p1, %p1439_p11 }
 0x285   : > { %p1437_p8 = pneg %p1436_p7 }
 0x286   : > { %p1443_p9 = por %p1442_p5, %p1441_p3 }
 0x288   : > { %p1444_p12 = pnand %p1443_p9, %p1437_p8 }
 0x28a   : > { %1447 = shalt.err (!%p1444_p12)
}
 0x28b   : > { %s1508_s20 = smov 256   ;;  %s1509_s8 = smov 16  }
 0x28c   : > { %1195 = dma.vmem_to_hbm [thread:$0]  (%p1964_p0), %s1896_s30, 4096, %s1894_s27, %s905_s25, %s1508_s20, %s1508_s20, %s1509_s8  }
 0x28d PF: > { %s952_s29 = sand.u32 1, %s1482_s21   ;;  %p1965_p2 = scmp.ne.s32.totalorder %s1955_s28, 0 }
 0x28e   : > { %p1966_p13 = scmp.ge.s32.totalorder %s1494_s24, 2  ;;  %s953_s16 = scalar_lea.sflag [#allocation4], %s952_s29 }
 0x290   : > { %p1211_p6 = pnand %p1966_p13, %p1965_p2 }
 0x292   : > { %1473 = dma.done.wait (!%p1211_p6), %s953_s16, 4096  }
 0x293   : > { %1475 = vsyncadd (!%p1211_p6), %s953_s16, 4294963200  ;;  %s962_s17 = scalar_lea.sflag [#allocation10], %s952_s29 }
 0x294   : > { %1477 = dma.done.wait (!%p1211_p6), %s962_s17, 32  }
 0x295   : > { %1479 = vsyncadd (!%p1211_p6), %s962_s17, 4294967264  ;;  %p24_p0 = scmp.ge.s32.totalorder %s1655_s26, 4   ;;  %s1967_s21 = smov %s1486_s22 }
 0x296   : > { %s1968_s22 = smov %s1490_s23  ;;  %s1969_s23 = smov %s1664_s11 }
 0x297   : > { %s1970_s24 = smov %s1655_s26  ;;  %26 = sbr.rel (!%p24_p0) target bundleno = 8 (0x8), region = 110 }
 0x29e   :  { %967 = vsyncpa [#allocation3], 1 }
 0x29f   :  { %969 = vsyncpa [#allocation3 + $0x1], 1 }
 0x2a0   :  { %970 = vsyncpa [#allocation6], 1 }
 0x2a1   :  { %971 = vsyncpa [#allocation4], 1 }
 0x2a2   :  { %973 = vsyncpa [#allocation4 + $0x1], 1 }
 0x2a3   :  { %974 = vsyncpa [#allocation10], 1 }
 0x2a4   :  { %976 = vsyncpa [#allocation10 + $0x1], 1 }

</bundles_post_ra>
